<compile_context>
chip_gen: v7x
topology: tpu7x:2x2x1
jax: 0.10.0
libtpu: 0.0.40
codegen_flags: <defaults>
</compile_context>

<pallas_src>
import math

import jax
import jax.numpy as jnp
from jax import lax
from jax.experimental import pallas as pl
from jax.experimental.pallas import tpu as pltpu

EPS = 1e-09
TEMP = 0.66  # only used by probtorch's concrete sampling, not by this forward

Z_PRIVATE = 50
Z_SHARED = 10
IN_DIM = 400
HID = 200
OUT_DIM = 2 * Z_PRIVATE + 2 * Z_SHARED  # 120

# MXU / lane-aligned padded dims (K of the first layer stays at 400).
HID_PAD = 256
OUT_PAD = 128


def _round_up(x, m):
    return ((x + m - 1) // m) * m


def _pick_batch_tile(B, batch_tile):
    """Batch tile: 16-row aligned (bf16 packing), capped, >=2 grid steps for
    v7x's dual TensorCores whenever B > 16; tiny batches use one exact tile."""
    if B <= 16:
        return max(B, 1)                      # block dim == full array dim
    half = _round_up(pl.cdiv(B, 2), 16)       # aim for >=2 tiles
    return max(16, min(batch_tile, half))


def encoder_a_kernel(x_ref,
                     w1_ref, w2_ref, w3_ref, w4_ref, w5_ref, w6_ref, w7_ref,
                     out_ref):
    """One batch tile of the 7-layer bias-free MLP + fused mu/std epilogue."""
    h = x_ref[...].astype(jnp.bfloat16)  # (TB, 400) bf16
    # 6 x (Linear(no bias) + ReLU): bf16 MXU matmuls with f32 accumulation.
    for w_ref in (w1_ref, w2_ref, w3_ref, w4_ref, w5_ref, w6_ref):
        acc = jnp.dot(h, w_ref[...], preferred_element_type=jnp.float32)
        h = jnp.maximum(acc, 0.0).astype(jnp.bfloat16)
    # Final Linear(256 -> 128 padded), no activation.
    stats = jnp.dot(h, w7_ref[...], preferred_element_type=jnp.float32)
    # Fused epilogue over the lane-dense 128 columns: mu columns keep raw
    # stats, logvar columns become sqrt(exp(.)+EPS). VPU/EUP work is free on
    # this MXU-bound kernel and halves the store traffic vs. two outputs.
    col = lax.broadcasted_iota(jnp.int32, stats.shape, 1)
    is_mu = ((col < Z_PRIVATE)
             | ((col >= 2 * Z_PRIVATE) & (col < 2 * Z_PRIVATE + Z_SHARED))
             | (col >= OUT_DIM))  # padding columns -> raw stats (zeros)
    out_ref[...] = jnp.where(is_mu, stats, jnp.sqrt(jnp.exp(stats) + EPS))


def init_encoder_a_params(key):
    """Deterministic kaiming-normal init (fan_in, ReLU gain), bias-free.

    PyTorch Linear stores weight as (out, in) and computes x @ W.T; we store
    the transposed (in, out) matrix directly so the kernel does x @ W.
    """
    dims = [(IN_DIM, HID)] + [(HID, HID)] * 5 + [(HID, OUT_DIM)]
    keys = jax.random.split(key, len(dims))
    weights = []
    for k, (fan_in, fan_out) in zip(keys, dims):
        std = math.sqrt(2.0 / fan_in)
        weights.append(
            (std * jax.random.normal(k, (fan_in, fan_out))).astype(jnp.float32))
    return weights


def pad_params_for_kernel(weights):
    """Zero-pad (in, out) f32 weights to MXU-aligned shapes, cast to bf16.

    The first layer keeps its true K=400 (no K padding needed); only the
    hidden/output widths are padded (exact for a bias-free Linear+ReLU chain).
    """
    targets = ([(IN_DIM, HID_PAD)] + [(HID_PAD, HID_PAD)] * 5
               + [(HID_PAD, OUT_PAD)])
    padded = []
    for w, (ti, to) in zip(weights, targets):
        fi, fo = w.shape
        wp = jnp.zeros((ti, to), jnp.float32).at[:fi, :fo].set(w)
        padded.append(wp.astype(jnp.bfloat16))
    return padded


def encoder_a_forward(x, padded_weights, *, batch_tile=1024):
    """x: (B, 400), ideally bf16 (f32 also accepted; cast happens in-kernel).
    padded_weights: 7 bf16 matrices from pad_params_for_kernel.

    Returns (muPrivate, stdPrivate, muShared, stdShared), each with a leading
    singleton 'num_samples' axis, matching stats.unsqueeze(0) in PyTorch.
    """
    B = x.shape[0]
    tb = _pick_batch_tile(B, batch_tile)
    num_steps = pl.cdiv(B, tb)
    grid = (num_steps,)

    b_work = num_steps * tb
    flops = 2 * b_work * (IN_DIM * HID_PAD + 5 * HID_PAD * HID_PAD
                          + HID_PAD * OUT_PAD)
    bytes_accessed = (x.size * x.dtype.itemsize
                      + sum(w.size * 2 for w in padded_weights)
                      + B * OUT_PAD * 4)
    cost = pl.CostEstimate(flops=flops,
                           transcendentals=b_work * OUT_PAD,
                           bytes_accessed=bytes_accessed)

    # Input: (tb, 400) block — last dim equals the full array dim (legal), so
    # no column padding; ragged batch handled by the pl.cdiv grid.
    in_specs = [pl.BlockSpec((tb, IN_DIM), lambda i: (i, 0))]
    # Weights: full-array block, same (0, 0) index every step -> VMEM-resident;
    # single-buffered since they are never re-fetched.
    in_specs += [
        pl.BlockSpec(w.shape, lambda i: (0, 0), pipeline_mode=pl.Buffered(1))
        for w in padded_weights
    ]
    out_specs = pl.BlockSpec((tb, OUT_PAD), lambda i: (i, 0))

    out = pl.pallas_call(
        encoder_a_kernel,
        out_shape=jax.ShapeDtypeStruct((B, OUT_PAD), jnp.float32),
        grid=grid,
        in_specs=in_specs,
        out_specs=out_specs,
        compiler_params=pltpu.CompilerParams(
            dimension_semantics=("parallel",),
            vmem_limit_bytes=32 * 1024 * 1024),
        cost_estimate=cost,
    )(x, *padded_weights)

    # Column layout of `out`: [mu_p(0:50) | std_p(50:100) | mu_s(100:110) |
    # std_s(110:120) | pad(120:128)]. unsqueeze(0) -> (1, B, dim).
    mu_p = out[:, :Z_PRIVATE][None]
    std_p = out[:, Z_PRIVATE:2 * Z_PRIVATE][None]
    mu_s = out[:, 2 * Z_PRIVATE:2 * Z_PRIVATE + Z_SHARED][None]
    std_s = out[:, 2 * Z_PRIVATE + Z_SHARED:OUT_DIM][None]
    return mu_p, std_p, mu_s, std_s


def reference_forward(x, weights):
    """Pure-JAX reference mirroring the kernel's bf16/f32-acc arithmetic.

    (Validates kernel-vs-kernel-style math; 1e-2 tolerance is the bf16 level,
    not fidelity to a full-f32 PyTorch forward.)
    """
    h = x.astype(jnp.bfloat16)
    for w in weights[:-1]:
        acc = jnp.dot(h, w.astype(jnp.bfloat16),
                      preferred_element_type=jnp.float32)
        h = jnp.maximum(acc, 0.0).astype(jnp.bfloat16)
    stats = jnp.dot(h, weights[-1].astype(jnp.bfloat16),
                    preferred_element_type=jnp.float32)[None]
    mu_p = stats[:, :, :Z_PRIVATE]
    std_p = jnp.sqrt(jnp.exp(stats[:, :, Z_PRIVATE:2 * Z_PRIVATE]) + EPS)
    mu_s = stats[:, :, 2 * Z_PRIVATE:2 * Z_PRIVATE + Z_SHARED]
    std_s = jnp.sqrt(jnp.exp(stats[:, :, 2 * Z_PRIVATE + Z_SHARED:]) + EPS)
    return mu_p, std_p, mu_s, std_s


if __name__ == "__main__":
    key = jax.random.PRNGKey(0)
    k_x, k_w = jax.random.split(key)

    B = 8  # small test batch
    x_f32 = jax.random.normal(k_x, (B, IN_DIM), dtype=jnp.float32)
    x_bf16 = x_f32.astype(jnp.bfloat16)  # preferred input dtype for the kernel

    weights = init_encoder_a_params(k_w)
    padded_weights = pad_params_for_kernel(weights)

    outs = encoder_a_forward(x_bf16, padded_weights)
    outs = jax.block_until_ready(outs)

    refs = reference_forward(x_f32, weights)
    for o, r in zip(outs, refs):
        assert o.shape == r.shape, (o.shape, r.shape)
        assert jnp.allclose(o, r, atol=1e-2, rtol=1e-2), "mismatch vs reference"

    print("KERNEL_OK")
</pallas_src>

<mosaic_0001>
module attributes {stable_mosaic.version = 11 : i64} {
  func.func @encoder_a_kernel(%arg0: i32, %arg1: memref<8x400xbf16, #tpu.memory_space<vmem>>, %arg2: memref<400x256xbf16, #tpu.memory_space<vmem>>, %arg3: memref<256x256xbf16, #tpu.memory_space<vmem>>, %arg4: memref<256x256xbf16, #tpu.memory_space<vmem>>, %arg5: memref<256x256xbf16, #tpu.memory_space<vmem>>, %arg6: memref<256x256xbf16, #tpu.memory_space<vmem>>, %arg7: memref<256x256xbf16, #tpu.memory_space<vmem>>, %arg8: memref<256x128xbf16, #tpu.memory_space<vmem>>, %arg9: memref<8x128xf32, #tpu.memory_space<vmem>>) attributes {dimension_semantics = [#tpu.dimension_semantics<parallel>], iteration_bounds = array<i64: 1>, scalar_prefetch = 0 : i64, scratch_operands = 0 : i64, tpu.core_type = #tpu.core_type<tc>, window_params = [{transform_indices = @transform_0, window_bounds = array<i64: 8, 400>}, {pipeline_mode = #tpu.pipeline_mode<synchronous>, transform_indices = @transform_1, window_bounds = array<i64: 400, 256>}, {pipeline_mode = #tpu.pipeline_mode<synchronous>, transform_indices = @transform_2, window_bounds = array<i64: 256, 256>}, {pipeline_mode = #tpu.pipeline_mode<synchronous>, transform_indices = @transform_3, window_bounds = array<i64: 256, 256>}, {pipeline_mode = #tpu.pipeline_mode<synchronous>, transform_indices = @transform_4, window_bounds = array<i64: 256, 256>}, {pipeline_mode = #tpu.pipeline_mode<synchronous>, transform_indices = @transform_5, window_bounds = array<i64: 256, 256>}, {pipeline_mode = #tpu.pipeline_mode<synchronous>, transform_indices = @transform_6, window_bounds = array<i64: 256, 256>}, {pipeline_mode = #tpu.pipeline_mode<synchronous>, transform_indices = @transform_7, window_bounds = array<i64: 256, 128>}, {transform_indices = @transform_8, window_bounds = array<i64: 8, 128>}]} {
    %c0 = arith.constant 0 : index
    %c0_0 = arith.constant 0 : index
    %0 = vector.load %arg1[%c0, %c0_0] : memref<8x400xbf16, #tpu.memory_space<vmem>>, vector<8x400xbf16>
    %c0_1 = arith.constant 0 : index
    %c0_2 = arith.constant 0 : index
    %1 = vector.load %arg2[%c0_1, %c0_2] : memref<400x256xbf16, #tpu.memory_space<vmem>>, vector<400x256xbf16>
    %cst = arith.constant dense<0.000000e+00> : vector<8x256xf32>
    %2 = tpu.matmul %0, %1, %cst {dimension_numbers = #tpu.dot_dimension_numbers<[1], [0], [0], [1], [0, 0, 1, 1], [], []>} : vector<8x400xbf16>, vector<400x256xbf16>, vector<8x256xf32> -> vector<8x256xf32>
    %cst_3 = arith.constant 0.000000e+00 : f32
    %3 = vector.broadcast %cst_3 : f32 to vector<8x256xf32>
    %4 = arith.maximumf %2, %3 : vector<8x256xf32>
    %5 = arith.truncf %4 : vector<8x256xf32> to vector<8x256xbf16>
    %c0_4 = arith.constant 0 : index
    %c0_5 = arith.constant 0 : index
    %6 = vector.load %arg3[%c0_4, %c0_5] : memref<256x256xbf16, #tpu.memory_space<vmem>>, vector<256x256xbf16>
    %cst_6 = arith.constant dense<0.000000e+00> : vector<8x256xf32>
    %7 = tpu.matmul %5, %6, %cst_6 {dimension_numbers = #tpu.dot_dimension_numbers<[1], [0], [0], [1], [0, 0, 1, 1], [], []>} : vector<8x256xbf16>, vector<256x256xbf16>, vector<8x256xf32> -> vector<8x256xf32>
    %cst_7 = arith.constant 0.000000e+00 : f32
    %8 = vector.broadcast %cst_7 : f32 to vector<8x256xf32>
    %9 = arith.maximumf %7, %8 : vector<8x256xf32>
    %10 = arith.truncf %9 : vector<8x256xf32> to vector<8x256xbf16>
    %c0_8 = arith.constant 0 : index
    %c0_9 = arith.constant 0 : index
    %11 = vector.load %arg4[%c0_8, %c0_9] : memref<256x256xbf16, #tpu.memory_space<vmem>>, vector<256x256xbf16>
    %cst_10 = arith.constant dense<0.000000e+00> : vector<8x256xf32>
    %12 = tpu.matmul %10, %11, %cst_10 {dimension_numbers = #tpu.dot_dimension_numbers<[1], [0], [0], [1], [0, 0, 1, 1], [], []>} : vector<8x256xbf16>, vector<256x256xbf16>, vector<8x256xf32> -> vector<8x256xf32>
    %cst_11 = arith.constant 0.000000e+00 : f32
    %13 = vector.broadcast %cst_11 : f32 to vector<8x256xf32>
    %14 = arith.maximumf %12, %13 : vector<8x256xf32>
    %15 = arith.truncf %14 : vector<8x256xf32> to vector<8x256xbf16>
    %c0_12 = arith.constant 0 : index
    %c0_13 = arith.constant 0 : index
    %16 = vector.load %arg5[%c0_12, %c0_13] : memref<256x256xbf16, #tpu.memory_space<vmem>>, vector<256x256xbf16>
    %cst_14 = arith.constant dense<0.000000e+00> : vector<8x256xf32>
    %17 = tpu.matmul %15, %16, %cst_14 {dimension_numbers = #tpu.dot_dimension_numbers<[1], [0], [0], [1], [0, 0, 1, 1], [], []>} : vector<8x256xbf16>, vector<256x256xbf16>, vector<8x256xf32> -> vector<8x256xf32>
    %cst_15 = arith.constant 0.000000e+00 : f32
    %18 = vector.broadcast %cst_15 : f32 to vector<8x256xf32>
    %19 = arith.maximumf %17, %18 : vector<8x256xf32>
    %20 = arith.truncf %19 : vector<8x256xf32> to vector<8x256xbf16>
    %c0_16 = arith.constant 0 : index
    %c0_17 = arith.constant 0 : index
    %21 = vector.load %arg6[%c0_16, %c0_17] : memref<256x256xbf16, #tpu.memory_space<vmem>>, vector<256x256xbf16>
    %cst_18 = arith.constant dense<0.000000e+00> : vector<8x256xf32>
    %22 = tpu.matmul %20, %21, %cst_18 {dimension_numbers = #tpu.dot_dimension_numbers<[1], [0], [0], [1], [0, 0, 1, 1], [], []>} : vector<8x256xbf16>, vector<256x256xbf16>, vector<8x256xf32> -> vector<8x256xf32>
    %cst_19 = arith.constant 0.000000e+00 : f32
    %23 = vector.broadcast %cst_19 : f32 to vector<8x256xf32>
    %24 = arith.maximumf %22, %23 : vector<8x256xf32>
    %25 = arith.truncf %24 : vector<8x256xf32> to vector<8x256xbf16>
    %c0_20 = arith.constant 0 : index
    %c0_21 = arith.constant 0 : index
    %26 = vector.load %arg7[%c0_20, %c0_21] : memref<256x256xbf16, #tpu.memory_space<vmem>>, vector<256x256xbf16>
    %cst_22 = arith.constant dense<0.000000e+00> : vector<8x256xf32>
    %27 = tpu.matmul %25, %26, %cst_22 {dimension_numbers = #tpu.dot_dimension_numbers<[1], [0], [0], [1], [0, 0, 1, 1], [], []>} : vector<8x256xbf16>, vector<256x256xbf16>, vector<8x256xf32> -> vector<8x256xf32>
    %cst_23 = arith.constant 0.000000e+00 : f32
    %28 = vector.broadcast %cst_23 : f32 to vector<8x256xf32>
    %29 = arith.maximumf %27, %28 : vector<8x256xf32>
    %30 = arith.truncf %29 : vector<8x256xf32> to vector<8x256xbf16>
    %c0_24 = arith.constant 0 : index
    %c0_25 = arith.constant 0 : index
    %31 = vector.load %arg8[%c0_24, %c0_25] : memref<256x128xbf16, #tpu.memory_space<vmem>>, vector<256x128xbf16>
    %cst_26 = arith.constant dense<0.000000e+00> : vector<8x128xf32>
    %32 = tpu.matmul %30, %31, %cst_26 {dimension_numbers = #tpu.dot_dimension_numbers<[1], [0], [0], [1], [0, 0, 1, 1], [], []>} : vector<8x256xbf16>, vector<256x128xbf16>, vector<8x128xf32> -> vector<8x128xf32>
    %33 = tpu.iota {dimensions = array<i32: 1>} : vector<8x128xi32>
    %c50_i32 = arith.constant 50 : i32
    %34 = vector.broadcast %c50_i32 : i32 to vector<8x128xi32>
    %35 = arith.cmpi slt, %33, %34 : vector<8x128xi32>
    %c100_i32 = arith.constant 100 : i32
    %36 = vector.broadcast %c100_i32 : i32 to vector<8x128xi32>
    %37 = arith.cmpi sge, %33, %36 : vector<8x128xi32>
    %c110_i32 = arith.constant 110 : i32
    %38 = vector.broadcast %c110_i32 : i32 to vector<8x128xi32>
    %39 = arith.cmpi slt, %33, %38 : vector<8x128xi32>
    %40 = arith.andi %37, %39 : vector<8x128xi1>
    %41 = arith.ori %35, %40 : vector<8x128xi1>
    %c120_i32 = arith.constant 120 : i32
    %42 = vector.broadcast %c120_i32 : i32 to vector<8x128xi32>
    %43 = arith.cmpi sge, %33, %42 : vector<8x128xi32>
    %44 = arith.ori %41, %43 : vector<8x128xi1>
    %45 = math.exp %32 : vector<8x128xf32>
    %cst_27 = arith.constant 9.99999971E-10 : f32
    %46 = vector.broadcast %cst_27 : f32 to vector<8x128xf32>
    %47 = arith.addf %45, %46 : vector<8x128xf32>
    %48 = math.sqrt %47 : vector<8x128xf32>
    %49 = arith.select %44, %32, %48 : vector<8x128xi1>, vector<8x128xf32>
    %c0_28 = arith.constant 0 : index
    %c0_29 = arith.constant 0 : index
    %50 = vector.load %arg9[%c0_28, %c0_29] : memref<8x128xf32, #tpu.memory_space<vmem>>, vector<8x128xf32>
    tpu.vector_store %arg9[%c0_28, %c0_29], %49 {strides = array<i32>} : memref<8x128xf32, #tpu.memory_space<vmem>>, vector<8x128xf32>,
    return
  }
  func.func @transform_0(%arg0: i32) -> (i32, i32) {
    %c0_i32 = arith.constant 0 : i32
    %c0_i32_0 = arith.constant 0 : i32
    return %arg0, %c0_i32 : i32, i32
  }
  func.func @transform_1(%arg0: i32) -> (i32, i32) {
    %c0_i32 = arith.constant 0 : i32
    %c0_i32_0 = arith.constant 0 : i32
    %c0_i32_1 = arith.constant 0 : i32
    return %c0_i32, %c0_i32_0 : i32, i32
  }
  func.func @transform_2(%arg0: i32) -> (i32, i32) {
    %c0_i32 = arith.constant 0 : i32
    %c0_i32_0 = arith.constant 0 : i32
    %c0_i32_1 = arith.constant 0 : i32
    return %c0_i32, %c0_i32_0 : i32, i32
  }
  func.func @transform_3(%arg0: i32) -> (i32, i32) {
    %c0_i32 = arith.constant 0 : i32
    %c0_i32_0 = arith.constant 0 : i32
    %c0_i32_1 = arith.constant 0 : i32
    return %c0_i32, %c0_i32_0 : i32, i32
  }
  func.func @transform_4(%arg0: i32) -> (i32, i32) {
    %c0_i32 = arith.constant 0 : i32
    %c0_i32_0 = arith.constant 0 : i32
    %c0_i32_1 = arith.constant 0 : i32
    return %c0_i32, %c0_i32_0 : i32, i32
  }
  func.func @transform_5(%arg0: i32) -> (i32, i32) {
    %c0_i32 = arith.constant 0 : i32
    %c0_i32_0 = arith.constant 0 : i32
    %c0_i32_1 = arith.constant 0 : i32
    return %c0_i32, %c0_i32_0 : i32, i32
  }
  func.func @transform_6(%arg0: i32) -> (i32, i32) {
    %c0_i32 = arith.constant 0 : i32
    %c0_i32_0 = arith.constant 0 : i32
    %c0_i32_1 = arith.constant 0 : i32
    return %c0_i32, %c0_i32_0 : i32, i32
  }
  func.func @transform_7(%arg0: i32) -> (i32, i32) {
    %c0_i32 = arith.constant 0 : i32
    %c0_i32_0 = arith.constant 0 : i32
    %c0_i32_1 = arith.constant 0 : i32
    return %c0_i32, %c0_i32_0 : i32, i32
  }
  func.func @transform_8(%arg0: i32) -> (i32, i32) {
    %c0_i32 = arith.constant 0 : i32
    %c0_i32_0 = arith.constant 0 : i32
    return %arg0, %c0_i32 : i32, i32
  }
}

</mosaic_0001>

<bundles_post_ra>
// kernel: tpu_custom_call.1
= control target key start
LH: loop header
LB: loop body
LE: loop exit
PB: predicated region body
PF: predicated region fallthrough
CT: control target
= control target key end

     0   :  { %13 = vsyncpa [#allocation3], 0  ;;  %s2951_s0 = inlined_call_operand.hbm [shape: bf16[8,400], index: 0, kind: input, shape index: {}]   ;;  %s2952_s1 = inlined_call_operand.hbm [shape: bf16[400,256], index: 1, kind: input, shape index: {}]   ;;  %s2953_s2 = inlined_call_operand.hbm [shape: bf16[256,256], index: 2, kind: input, shape index: {}]   ;;  %s2954_s3 = inlined_call_operand.hbm [shape: bf16[256,256], index: 3, kind: input, shape index: {}]   ;;  %s2955_s4 = inlined_call_operand.hbm [shape: bf16[256,256], index: 4, kind: input, shape index: {}]   ;;  %s2956_s5 = inlined_call_operand.hbm [shape: bf16[256,256], index: 5, kind: input, shape index: {}]   ;;  %s2957_s6 = inlined_call_operand.hbm [shape: bf16[256,256], index: 6, kind: input, shape index: {}]   ;;  %s2958_s7 = inlined_call_operand.hbm [shape: bf16[256,128], index: 7, kind: input, shape index: {}]   ;;  %s2959_s8 = inlined_call_operand.hbm [shape: f32[8,128], index: 8, kind: output, shape index: {}]  }
   0x1   :  { %14 = vsyncpa [#allocation6], 0 }
   0x2   :  { %15 = vsyncpa [#allocation9], 0 }
   0x3   :  { %16 = vsyncpa [#allocation12], 0 }
   0x4   :  { %17 = vsyncpa [#allocation15], 0 }
   0x5   :  { %18 = vsyncpa [#allocation4], 0  ;;  %s2755_s27 = smov [#allocation5]   ;;  %s2545_s9 = scalar_lea.hbm %s2952_s1, 6400 }
   0x6   :  { %s34_s28 = sshll.u32 %s2755_s27, 4  ;;  %p2546_p0 = scmp.ne.s32.totalorder %s2952_s1, %s2545_s9  ;;  %s35_s28 = int_to_ptr.vmem [resolvable:$true] %s34_s28 }
   0x7   :  { %p2549_p1 = scmp.lt.u32.totalorder %s2545_s9, %s2952_s1 }
   0x9   :  { %p2551_p2 = pnand %p2549_p1, %p2546_p0 }
   0xb   :  { %2554 = shalt.err (!%p2551_p2)
}
   0xc   :  { %s2555_s14 = scalar_lea.vmem %s35_s28, 6400  ;;  %p2560_p4 = scmp.lt.s32.totalorder %s35_s28, %s35_s28 }
   0xd   :  { %p2556_p3 = scmp.ne.s32.totalorder %s35_s28, %s2555_s14  ;;  %p2561_p5 = scmp.lt.s32.totalorder %s2555_s14, %s2555_s14 }
   0xf   :  { %p2562_p6 = por %p2561_p5, %p2560_p4 }
  0x11   :  { %p2563_p7 = pnand %p2562_p6, %p2556_p3 }
  0x13   :  { %2566 = shalt.err (!%p2563_p7)
}
  0x14   :  { %s2756_s15 = smov 128   ;;  %s2757_s16 = smov 8  }
  0x15   :  { %40 = dma.hbm_to_vmem [thread:$0]  %s2952_s1, 6400, %s35_s28, [#allocation6], %s2756_s15, %s2756_s15, %s2757_s16  }
  0x16   :  { %s2758_s19 = smov [#allocation8]   ;;  %s2759_s21 = smov [#allocation11]  }
  0x17   :  { %s58_s20 = sshll.u32 %s2758_s19, 4  ;;  %s82_s22 = sshll.u32 %s2759_s21, 4  ;;  %s59_s20 = int_to_ptr.vmem [resolvable:$true] %s58_s20  ;;  %s83_s22 = int_to_ptr.vmem [resolvable:$true] %s82_s22 }
  0x18   :  { %s2567_s25 = scalar_lea.hbm %s2954_s3, 4096 }
  0x19   :  { %p2568_p8 = scmp.ne.s32.totalorder %s2954_s3, %s2567_s25  ;;  %p2571_p9 = scmp.lt.u32.totalorder %s2567_s25, %s2954_s3 }
  0x1b   :  { %p2573_p10 = pnand %p2571_p9, %p2568_p8 }
  0x1d   :  { %2576 = shalt.err (!%p2573_p10)
}
  0x1e   :  { %s2577_s1 = scalar_lea.vmem %s59_s20, 4096  ;;  %p2582_p12 = scmp.lt.s32.totalorder %s59_s20, %s59_s20 }
  0x1f   :  { %p2578_p11 = scmp.ne.s32.totalorder %s59_s20, %s2577_s1  ;;  %p2583_p13 = scmp.lt.s32.totalorder %s2577_s1, %s2577_s1 }
  0x21   :  { %p2584_p0 = por %p2583_p13, %p2582_p12 }
  0x23   :  { %p2585_p1 = pnand %p2584_p0, %p2578_p11 }
  0x25   :  { %2588 = shalt.err (!%p2585_p1)
}
  0x26   :  { %64 = dma.hbm_to_vmem [thread:$0]  %s2954_s3, 4096, %s59_s20, [#allocation9], %s2756_s15, %s2756_s15, %s2757_s16  }
  0x27   :  { %s2589_s12 = scalar_lea.hbm %s2956_s5, 4096 }
  0x28   :  { %p2590_p2 = scmp.ne.s32.totalorder %s2956_s5, %s2589_s12  ;;  %p2593_p3 = scmp.lt.u32.totalorder %s2589_s12, %s2956_s5 }
  0x2a   :  { %p2595_p4 = pnand %p2593_p3, %p2590_p2 }
  0x2c   :  { %2598 = shalt.err (!%p2595_p4)
}
  0x2d   :  { %s2599_s19 = scalar_lea.vmem %s83_s22, 4096  ;;  %p2604_p6 = scmp.lt.s32.totalorder %s83_s22, %s83_s22 }
  0x2e   :  { %p2600_p5 = scmp.ne.s32.totalorder %s83_s22, %s2599_s19  ;;  %p2605_p7 = scmp.lt.s32.totalorder %s2599_s19, %s2599_s19 }
  0x30   :  { %p2606_p8 = por %p2605_p7, %p2604_p6 }
  0x32   :  { %p2607_p9 = pnand %p2606_p8, %p2600_p5 }
  0x34   :  { %2610 = shalt.err (!%p2607_p9)
}
  0x35   :  { %88 = dma.hbm_to_vmem [thread:$0]  %s2956_s5, 4096, %s83_s22, [#allocation12], %s2756_s15, %s2756_s15, %s2757_s16  }
  0x36   :  { %s2760_s21 = smov [#allocation2]   ;;  %s2761_s24 = smov [#allocation7]  }
  0x37   :  { %s25_s23 = sshll.u32 %s2760_s21, 4  ;;  %s46_s25 = sshll.u32 %s2761_s24, 4  ;;  %s26_s23 = int_to_ptr.vmem [resolvable:$true] %s25_s23  ;;  %s47_s25 = int_to_ptr.vmem [resolvable:$true] %s46_s25 }
  0x38   :  { %s2611_s29 = scalar_lea.hbm %s2951_s0, 256 }
  0x39   :  { %p2612_p10 = scmp.ne.s32.totalorder %s2951_s0, %s2611_s29  ;;  %p2615_p11 = scmp.lt.u32.totalorder %s2611_s29, %s2951_s0 }
  0x3b   :  { %p2617_p12 = pnand %p2615_p11, %p2612_p10 }
  0x3d   :  { %2620 = shalt.err (!%p2617_p12)
}
  0x3e   :  { %s2621_s5 = scalar_lea.vmem %s26_s23, 256  ;;  %p2626_p0 = scmp.lt.s32.totalorder %s26_s23, %s26_s23 }
  0x3f   :  { %p2622_p13 = scmp.ne.s32.totalorder %s26_s23, %s2621_s5  ;;  %p2627_p1 = scmp.lt.s32.totalorder %s2621_s5, %s2621_s5 }
  0x41   :  { %p2628_p2 = por %p2627_p1, %p2626_p0 }
  0x43   :  { %p2629_p3 = pnand %p2628_p2, %p2622_p13 }
  0x45   :  { %2632 = shalt.err (!%p2629_p3)
}
  0x46   :  { %28 = dma.hbm_to_vmem [thread:$0]  %s2951_s0, 256, %s26_s23, [#allocation3]  }
  0x47   :  { %s2633_s13 = scalar_lea.hbm %s2953_s2, 4096 }
  0x48   :  { %p2634_p4 = scmp.ne.s32.totalorder %s2953_s2, %s2633_s13  ;;  %p2637_p5 = scmp.lt.u32.totalorder %s2633_s13, %s2953_s2 }
  0x4a   :  { %p2639_p6 = pnand %p2637_p5, %p2634_p4 }
  0x4c   :  { %2642 = shalt.err (!%p2639_p6)
}
  0x4d   :  { %s2643_s3 = scalar_lea.vmem %s47_s25, 4096  ;;  %p2648_p8 = scmp.lt.s32.totalorder %s47_s25, %s47_s25 }
  0x4e   :  { %p2644_p7 = scmp.ne.s32.totalorder %s47_s25, %s2643_s3  ;;  %p2649_p9 = scmp.lt.s32.totalorder %s2643_s3, %s2643_s3 }
  0x50   :  { %p2650_p10 = por %p2649_p9, %p2648_p8 }
  0x52   :  { %p2651_p11 = pnand %p2650_p10, %p2644_p7 }
  0x54   :  { %2654 = shalt.err (!%p2651_p11)
}
  0x55   :  { %52 = dma.hbm_to_vmem [thread:$0]  %s2953_s2, 4096, %s47_s25, [#allocation6], %s2756_s15, %s2756_s15, %s2757_s16  }
  0x56   :  { %s2762_s21 = smov [#allocation10]   ;;  %s2763_s24 = smov [#allocation13]  }
  0x57   :  { %s70_s23 = sshll.u32 %s2762_s21, 4  ;;  %s94_s26 = sshll.u32 %s2763_s24, 4  ;;  %s71_s23 = int_to_ptr.vmem [resolvable:$true] %s70_s23  ;;  %s95_s26 = int_to_ptr.vmem [resolvable:$true] %s94_s26 }
  0x58   :  { %s2655_s30 = scalar_lea.hbm %s2955_s4, 4096 }
  0x59   :  { %p2656_p12 = scmp.ne.s32.totalorder %s2955_s4, %s2655_s30  ;;  %p2659_p13 = scmp.lt.u32.totalorder %s2655_s30, %s2955_s4 }
  0x5b   :  { %p2661_p0 = pnand %p2659_p13, %p2656_p12 }
  0x5d   :  { %2664 = shalt.err (!%p2661_p0)
}
  0x5e   :  { %s2665_s2 = scalar_lea.vmem %s71_s23, 4096  ;;  %p2670_p2 = scmp.lt.s32.totalorder %s71_s23, %s71_s23 }
  0x5f   :  { %p2666_p1 = scmp.ne.s32.totalorder %s71_s23, %s2665_s2  ;;  %p2671_p3 = scmp.lt.s32.totalorder %s2665_s2, %s2665_s2 }
  0x61   :  { %p2672_p4 = por %p2671_p3, %p2670_p2 }
  0x63   :  { %p2673_p5 = pnand %p2672_p4, %p2666_p1 }
  0x65   :  { %2676 = shalt.err (!%p2673_p5)
}
  0x66   :  { %76 = dma.hbm_to_vmem [thread:$0]  %s2955_s4, 4096, %s71_s23, [#allocation9], %s2756_s15, %s2756_s15, %s2757_s16  }
  0x67   :  { %s2677_s12 = scalar_lea.hbm %s2957_s6, 4096 }
  0x68   :  { %p2678_p6 = scmp.ne.s32.totalorder %s2957_s6, %s2677_s12  ;;  %p2681_p7 = scmp.lt.u32.totalorder %s2677_s12, %s2957_s6 }
  0x6a   :  { %p2683_p8 = pnand %p2681_p7, %p2678_p6 }
  0x6c   :  { %2686 = shalt.err (!%p2683_p8)
}
  0x6d   :  { %s2687_s19 = scalar_lea.vmem %s95_s26, 4096  ;;  %p2692_p10 = scmp.lt.s32.totalorder %s95_s26, %s95_s26 }
  0x6e   :  { %p2688_p9 = scmp.ne.s32.totalorder %s95_s26, %s2687_s19  ;;  %p2693_p11 = scmp.lt.s32.totalorder %s2687_s19, %s2687_s19 }
  0x70   :  { %p2694_p12 = por %p2693_p11, %p2692_p10 }
  0x72   :  { %p2695_p13 = pnand %p2694_p12, %p2688_p9 }
  0x74   :  { %2698 = shalt.err (!%p2695_p13)
}
  0x75   :  { %100 = dma.hbm_to_vmem [thread:$0]  %s2957_s6, 4096, %s95_s26, [#allocation12], %s2756_s15, %s2756_s15, %s2757_s16  }
  0x76   :  { %s2764_s0 = smov [#allocation14]   ;;  %s2699_s24 = scalar_lea.hbm %s2958_s7, 2048 }
  0x77   :  { %s106_s20 = sshll.u32 %s2764_s0, 4  ;;  %p2700_p0 = scmp.ne.s32.totalorder %s2958_s7, %s2699_s24  ;;  %s107_s20 = int_to_ptr.vmem [resolvable:$true] %s106_s20 }
  0x78   :  { %p2703_p1 = scmp.lt.u32.totalorder %s2699_s24, %s2958_s7 }
  0x7a   :  { %p2705_p2 = pnand %p2703_p1, %p2700_p0 }
  0x7c   :  { %2708 = shalt.err (!%p2705_p2)
}
  0x7d   :  { %s2709_s28 = scalar_lea.vmem %s107_s20, 2048  ;;  %p2714_p4 = scmp.lt.s32.totalorder %s107_s20, %s107_s20 }
  0x7e   :  { %p2710_p3 = scmp.ne.s32.totalorder %s107_s20, %s2709_s28  ;;  %p2715_p5 = scmp.lt.s32.totalorder %s2709_s28, %s2709_s28 }
  0x80   :  { %p2716_p6 = por %p2715_p5, %p2714_p4 }
  0x82   :  { %p2717_p7 = pnand %p2716_p6, %p2710_p3 }
  0x84   :  { %2720 = shalt.err (!%p2717_p7)
}
  0x85   :  { %s2765_s6 = smov 64   ;;  %s2766_s15 = smov 4  }
  0x86   :  { %112 = dma.hbm_to_vmem [thread:$0]  %s2958_s7, 2048, %s107_s20, [#allocation15], %s2765_s6, %s2765_s6, %s2766_s15  }
  0x87   :  { %2743 = dma.done.wait [#allocation3], 256  }
  0x88   :  { %2744 = vsyncadd [#allocation3], 4294967040 }
  0x89   :  { %2745 = dma.done.wait [#allocation6], 10496  }
  0x8a   :  { %2746 = vsyncadd [#allocation6], 4294956800 }
  0x8b   :  { %2747 = dma.done.wait [#allocation9], 8192  }
  0x8c   :  { %2748 = vsyncadd [#allocation9], 4294959104 }
  0x8d   :  { %2749 = dma.done.wait [#allocation12], 8192  }
  0x8e   :  { %2750 = vsyncadd [#allocation12], 4294959104 }
  0x8f   :  { %2751 = dma.done.wait [#allocation15], 2048  }
  0x90   :  { %2752 = vsyncadd [#allocation15], 4294965248  ;;  %v2206_v0 = vld [vmem:[#allocation5 + $0x4] ss:$8 sps:$4 sm:$0xff]   ;;  %v2208_v1 = vld [vmem:[#allocation5] ss:$8 sps:$4 sm:$0xff]  }
  0x91   :  { %457 = vmatprep.subr.bf16.mxu0 %v2206_v0  ;;  %v2209_v2 = vld [vmem:[#allocation5 + $0x14] ss:$8 sps:$4 sm:$0xff]   ;;  %v2211_v3 = vld [vmem:[#allocation5 + $0x10] ss:$8 sps:$4 sm:$0xff]   ;;  %v2212_v4 = vld [vmem:[#allocation5 + $0x24] ss:$8 sps:$4 sm:$0xff]  }
  0x92   :  { %458 = vmatpush1.bf16.msra.mxu0 %v2208_v1  ;;  %v2214_v5 = vld [vmem:[#allocation5 + $0x20] ss:$8 sps:$4 sm:$0xff]   ;;  %v2215_v6 = vld [vmem:[#allocation5 + $0x34] ss:$8 sps:$4 sm:$0xff]   ;;  %v2217_v7 = vld [vmem:[#allocation5 + $0x30] ss:$8 sps:$4 sm:$0xff]  }
  0x93   :  { %459 = vmatprep.subr.bf16.mxu0 %v2209_v2  ;;  %v2218_v8 = vld [vmem:[#allocation5 + $0x44] ss:$8 sps:$4 sm:$0xff]   ;;  %v2220_v9 = vld [vmem:[#allocation5 + $0x40] ss:$8 sps:$4 sm:$0xff]   ;;  %v2221_v10 = vld [vmem:[#allocation5 + $0x54] ss:$8 sps:$4 sm:$0xff]  }
  0x94   :  { %v2223_v11 = vld [vmem:[#allocation5 + $0x50] ss:$8 sps:$4 sm:$0xff]   ;;  %v2224_v12 = vld [vmem:[#allocation5 + $0x64] ss:$8 sps:$4 sm:$0xff]   ;;  %v2226_v15 = vld [vmem:[#allocation5 + $0x60] ss:$8 sps:$4 sm:$0xff]  }
  0x95   :  { %v2927_v13 = vld [vmem:[#allocation2] sm:$0xff]  ;;  %v2230_v18 = vld [vmem:[#allocation5 + $0x84] ss:$8 sps:$4 sm:$0xff]   ;;  %v2232_v19 = vld [vmem:[#allocation5 + $0x80] ss:$8 sps:$4 sm:$0xff]   ;;  %vm453_vm0 = vcmask 130048  }
  0x96   :  { %460 = vmatpush1.bf16.msra.mxu0 %v2211_v3  ;;  %v1937_v14 = vcombine.high %v2927_v13, %v2927_v13  ;;  %v2227_v16 = vld [vmem:[#allocation5 + $0x74] ss:$8 sps:$4 sm:$0xff]   ;;  %v2229_v17 = vld [vmem:[#allocation5 + $0x70] ss:$8 sps:$4 sm:$0xff]   ;;  %v2236_v24 = vld [vmem:[#allocation5 + $0xa4] ss:$8 sps:$4 sm:$0xff]   ;;  %v1936_v54 = vcombine.low %v2927_v13, %v2927_v13 }
  0x97   :  { %461 = vmatprep.subr.bf16.mxu0 %v2212_v4  ;;  %v2233_v20 = vld [vmem:[#allocation5 + $0x94] ss:$8 sps:$4 sm:$0xff]   ;;  %v2235_v21 = vld [vmem:[#allocation5 + $0x90] ss:$8 sps:$4 sm:$0xff]   ;;  %v2288_v25 = vld [vmem:[#allocation7 + $0x14] ss:$8 sps:$4 sm:$0xff]  }
  0x98   :  { %489 = vmatprep.mubr.bf16.mxu0 %v1937_v14  ;;  %v2285_v22 = vld [vmem:[#allocation7 + $0x4] ss:$8 sps:$4 sm:$0xff]   ;;  %v2287_v23 = vld [vmem:[#allocation7] ss:$8 sps:$4 sm:$0xff]   ;;  %v2290_v26 = vld [vmem:[#allocation7 + $0x10] ss:$8 sps:$4 sm:$0xff]  }
  0x99   :  { %735 = vmatprep.subr.bf16.mxu1 %v2285_v22  ;;  %v2291_v27 = vld [vmem:[#allocation7 + $0x24] ss:$8 sps:$4 sm:$0xff]   ;;  %v2238_v28 = vld [vmem:[#allocation5 + $0xa0] ss:$8 sps:$4 sm:$0xff]   ;;  %v2293_v30 = vld [vmem:[#allocation7 + $0x20] ss:$8 sps:$4 sm:$0xff]  }
  0x9a   :  { %462 = vmatpush1.bf16.msra.mxu0 %v2214_v5  ;;  %736 = vmatpush1.bf16.msra.mxu1 %v2287_v23  ;;  %v2239_v29 = vld [vmem:[#allocation5 + $0xb4] ss:$8 sps:$4 sm:$0xff]   ;;  %v2294_v31 = vld [vmem:[#allocation7 + $0x34] ss:$8 sps:$4 sm:$0xff]   ;;  %v2241_v32 = vld [vmem:[#allocation5 + $0xb0] ss:$8 sps:$4 sm:$0xff]  }
  0x9b   :  { %463 = vmatprep.subr.bf16.mxu0 %v2215_v6  ;;  %737 = vmatprep.subr.bf16.mxu1 %v2288_v25  ;;  %v2242_v33 = vld [vmem:[#allocation5 + $0xc4] ss:$8 sps:$4 sm:$0xff]   ;;  %v2296_v34 = vld [vmem:[#allocation7 + $0x30] ss:$8 sps:$4 sm:$0xff]   ;;  %v2297_v35 = vld [vmem:[#allocation7 + $0x44] ss:$8 sps:$4 sm:$0xff]  }
  0x9c   :  { %v2244_v36 = vld [vmem:[#allocation5 + $0xc0] ss:$8 sps:$4 sm:$0xff]   ;;  %v2245_v37 = vld [vmem:[#allocation5 + $0xd4] ss:$8 sps:$4 sm:$0xff]   ;;  %v2299_v38 = vld [vmem:[#allocation7 + $0x40] ss:$8 sps:$4 sm:$0xff]  }
  0x9d   :  { %v2300_v39 = vld [vmem:[#allocation7 + $0x54] ss:$8 sps:$4 sm:$0xff]   ;;  %v2247_v40 = vld [vmem:[#allocation5 + $0xd0] ss:$8 sps:$4 sm:$0xff]   ;;  %v2302_v42 = vld [vmem:[#allocation7 + $0x50] ss:$8 sps:$4 sm:$0xff]  }
  0x9e   :  { %464 = vmatpush1.bf16.msra.mxu0 %v2217_v7  ;;  %738 = vmatpush1.bf16.msra.mxu1 %v2290_v26  ;;  %v2248_v41 = vld [vmem:[#allocation5 + $0xe4] ss:$8 sps:$4 sm:$0xff]   ;;  %v2250_v43 = vld [vmem:[#allocation5 + $0xe0] ss:$8 sps:$4 sm:$0xff]   ;;  %v2303_v44 = vld [vmem:[#allocation7 + $0x64] ss:$8 sps:$4 sm:$0xff]  }
  0x9f   :  { %465 = vmatprep.subr.bf16.mxu0 %v2218_v8  ;;  %739 = vmatprep.subr.bf16.mxu1 %v2291_v27  ;;  %v2251_v45 = vld [vmem:[#allocation5 + $0xf4] ss:$8 sps:$4 sm:$0xff]   ;;  %v2305_v46 = vld [vmem:[#allocation7 + $0x60] ss:$8 sps:$4 sm:$0xff]   ;;  %v2306_v47 = vld [vmem:[#allocation7 + $0x74] ss:$8 sps:$4 sm:$0xff]  }
  0xa0   :  { %v2253_v48 = vld [vmem:[#allocation5 + $0xf0] ss:$8 sps:$4 sm:$0xff]   ;;  %v2258_v49 = vld [vmem:[#allocation5 + $0x104] ss:$8 sps:$4 sm:$0xff]   ;;  %v2308_v51 = vld [vmem:[#allocation7 + $0x70] ss:$8 sps:$4 sm:$0xff]  }
  0xa1   :  { %v2931_v50 = vld [vmem:[#allocation2 + $0x8] sm:$0xff]  ;;  %v2256_v53 = vld [vmem:[#allocation5 + $0x100] ss:$8 sps:$4 sm:$0xff]   ;;  %v2312_v58 = vld [vmem:[#allocation7 + $0x94] ss:$8 sps:$4 sm:$0xff]   ;;  %s2767_s7 = smov [#allocation16]  }
  0xa2   :  { %466 = vmatpush1.bf16.msra.mxu0 %v2220_v9  ;;  %740 = vmatpush1.bf16.msra.mxu1 %v2293_v30  ;;  %v2309_v52 = vld [vmem:[#allocation7 + $0x84] ss:$8 sps:$4 sm:$0xff]   ;;  %v1939_v56 = vcombine.high %v2931_v50, %v2931_v50  ;;  %v2311_v57 = vld [vmem:[#allocation7 + $0x80] ss:$8 sps:$4 sm:$0xff]   ;;  %v2264_v60 = vld [vmem:[#allocation5 + $0x124] ss:$8 sps:$4 sm:$0xff]  }
  0xa3   :  { %467 = vmatprep.subr.bf16.mxu0 %v2221_v10  ;;  %741 = vmatprep.subr.bf16.mxu1 %v2294_v31  ;;  %v2261_v55 = vld [vmem:[#allocation5 + $0x114] ss:$8 sps:$4 sm:$0xff]   ;;  %v2259_v59 = vld [vmem:[#allocation5 + $0x110] ss:$8 sps:$4 sm:$0xff]   ;;  %v2314_v61 = vld [vmem:[#allocation7 + $0x90] ss:$8 sps:$4 sm:$0xff]  }
  0xa4   :  { %v2315_v62 = vld [vmem:[#allocation7 + $0xa4] ss:$8 sps:$4 sm:$0xff]   ;;  %v2262_v63 = vld [vmem:[#allocation5 + $0x120] ss:$8 sps:$4 sm:$0xff]   ;;  %v2317_v1 = vld [vmem:[#allocation7 + $0xa0] ss:$8 sps:$4 sm:$0xff]  }
  0xa5   :  { %v2267_v0 = vld [vmem:[#allocation5 + $0x134] ss:$8 sps:$4 sm:$0xff]   ;;  %v2318_v2 = vld [vmem:[#allocation7 + $0xb4] ss:$8 sps:$4 sm:$0xff]   ;;  %v2265_v3 = vld [vmem:[#allocation5 + $0x130] ss:$8 sps:$4 sm:$0xff]  }
  0xa6   :  { %468 = vmatpush1.bf16.msra.mxu0 %v2223_v11  ;;  %742 = vmatpush1.bf16.msra.mxu1 %v2296_v34  ;;  %v2270_v4 = vld [vmem:[#allocation5 + $0x144] ss:$8 sps:$4 sm:$0xff]   ;;  %v2320_v5 = vld [vmem:[#allocation7 + $0xb0] ss:$8 sps:$4 sm:$0xff]   ;;  %v2321_v6 = vld [vmem:[#allocation7 + $0xc4] ss:$8 sps:$4 sm:$0xff]  }
  0xa7   :  { %469 = vmatprep.subr.bf16.mxu0 %v2224_v12  ;;  %743 = vmatprep.subr.bf16.mxu1 %v2297_v35  ;;  %v2268_v7 = vld [vmem:[#allocation5 + $0x140] ss:$8 sps:$4 sm:$0xff]   ;;  %v2273_v8 = vld [vmem:[#allocation5 + $0x154] ss:$8 sps:$4 sm:$0xff]   ;;  %v2323_v9 = vld [vmem:[#allocation7 + $0xc0] ss:$8 sps:$4 sm:$0xff]  }
  0xa8   :  { %v2324_v10 = vld [vmem:[#allocation7 + $0xd4] ss:$8 sps:$4 sm:$0xff]   ;;  %v2271_v11 = vld [vmem:[#allocation5 + $0x150] ss:$8 sps:$4 sm:$0xff]   ;;  %v2326_v13 = vld [vmem:[#allocation7 + $0xd0] ss:$8 sps:$4 sm:$0xff]  }
  0xa9   :  { %v2276_v12 = vld [vmem:[#allocation5 + $0x164] ss:$8 sps:$4 sm:$0xff]   ;;  %v2327_v14 = vld [vmem:[#allocation7 + $0xe4] ss:$8 sps:$4 sm:$0xff]   ;;  %v2332_v23 = vld [vmem:[#allocation7 + $0xf0] ss:$8 sps:$4 sm:$0xff]  }
  0xaa   :  { %470 = vmatpush1.bf16.msra.mxu0 %v2226_v15  ;;  %744 = vmatpush1.bf16.msra.mxu1 %v2299_v38  ;;  %v2274_v15 = vld [vmem:[#allocation5 + $0x160] ss:$8 sps:$4 sm:$0xff]   ;;  %v2330_v22 = vld [vmem:[#allocation7 + $0xf4] ss:$8 sps:$4 sm:$0xff]   ;;  %s1923_s9 = sshll.u32 %s2767_s7, 4  ;;  %s1924_s9 = int_to_ptr.vmem [resolvable:$true] %s1923_s9 }
  0xab   :  { %471 = vmatprep.subr.bf16.mxu0 %v2227_v16  ;;  %745 = vmatprep.subr.bf16.mxu1 %v2300_v39  ;;  %v2279_v16 = vld [vmem:[#allocation5 + $0x174] ss:$8 sps:$4 sm:$0xff]   ;;  %v2338_v34 = vld [vmem:[#allocation8 + $0x14] ss:$8 sps:$4 sm:$0xff]   ;;  %v2336_v35 = vld [vmem:[#allocation8 + $0x10] ss:$8 sps:$4 sm:$0xff]   ;;  %p2726_p9 = scmp.lt.s32.totalorder %s1924_s9, %s1924_s9 }
  0xac   :  { %v2344_v38 = vld [vmem:[#allocation8 + $0x34] ss:$8 sps:$4 sm:$0xff]   ;;  %v2342_v39 = vld [vmem:[#allocation8 + $0x30] ss:$8 sps:$4 sm:$0xff]   ;;  %s2721_s5 = scalar_lea.vmem %s1924_s9, 128 }
  0xad   :  { %p2722_p8 = scmp.ne.s32.totalorder %s1924_s9, %s2721_s5  ;;  %p2727_p10 = scmp.lt.s32.totalorder %s2721_s5, %s2721_s5 }
  0xae   :  { %472 = vmatpush1.bf16.msra.mxu0 %v2229_v17  ;;  %746 = vmatpush1.bf16.msra.mxu1 %v2302_v42  ;;  %v2277_v17 = vld [vmem:[#allocation5 + $0x170] ss:$8 sps:$4 sm:$0xff]   ;;  %v2350_v42 = vld [vmem:[#allocation8 + $0x54] ss:$8 sps:$4 sm:$0xff]  }
  0xaf   :  { %473 = vmatprep.subr.bf16.mxu0 %v2230_v18  ;;  %747 = vmatprep.subr.bf16.mxu1 %v2303_v44  ;;  %v2282_v18 = vld [vmem:[#allocation5 + $0x184] ss:$8 sps:$4 sm:$0xff]   ;;  %v2353_v44 = vld [vmem:[#allocation8 + $0x64] ss:$8 sps:$4 sm:$0xff]   ;;  %p2728_p11 = por %p2727_p10, %p2726_p9 }
  0xb1   :  { %p2729_p12 = pnand %p2728_p11, %p2722_p8 }
  0xb2   :  { %474 = vmatpush1.bf16.msra.mxu0 %v2232_v19  ;;  %748 = vmatpush1.bf16.msra.mxu1 %v2305_v46  ;;  %v2280_v19 = vld [vmem:[#allocation5 + $0x180] ss:$8 sps:$4 sm:$0xff]   ;;  %v2356_v46 = vld [vmem:[#allocation8 + $0x74] ss:$8 sps:$4 sm:$0xff]  }
  0xb3   :  { %475 = vmatprep.subr.bf16.mxu0 %v2233_v20  ;;  %749 = vmatprep.subr.bf16.mxu1 %v2306_v47  ;;  %v1938_v20 = vcombine.low %v2931_v50, %v2931_v50  ;;  %v2354_v47 = vld [vmem:[#allocation8 + $0x70] ss:$8 sps:$4 sm:$0xff]   ;;  %v2362_v50 = vld [vmem:[#allocation8 + $0x94] ss:$8 sps:$4 sm:$0xff]  }
  0xb6   :  { %476 = vmatpush1.bf16.msra.mxu0 %v2235_v21  ;;  %750 = vmatpush1.bf16.msra.mxu1 %v2308_v51  ;;  %v2329_v21 = vld [vmem:[#allocation7 + $0xe0] ss:$8 sps:$4 sm:$0xff]   ;;  %v2360_v51 = vld [vmem:[#allocation8 + $0x90] ss:$8 sps:$4 sm:$0xff]  }
  0xb7   :  { %477 = vmatprep.subr.bf16.mxu0 %v2236_v24  ;;  %751 = vmatprep.subr.bf16.mxu1 %v2309_v52  ;;  %v2335_v24 = vld [vmem:[#allocation8 + $0x4] ss:$8 sps:$4 sm:$0xff]  }
  0xb8   :  { %v2365_v52 = vld [vmem:[#allocation8 + $0xa4] ss:$8 sps:$4 sm:$0xff]  }
  0xba   :  { %478 = vmatpush1.bf16.msra.mxu0 %v2238_v28  ;;  %752 = vmatpush1.bf16.msra.mxu1 %v2311_v57  ;;  %v2369_v57 = vld [vmem:[#allocation8 + $0xc0] ss:$8 sps:$4 sm:$0xff]  }
  0xbb   :  { %479 = vmatprep.subr.bf16.mxu0 %v2239_v29  ;;  %753 = vmatprep.subr.bf16.mxu1 %v2312_v58  ;;  %v2374_v58 = vld [vmem:[#allocation8 + $0xd4] ss:$8 sps:$4 sm:$0xff]  }
  0xbe   :  { %480 = vmatpush1.bf16.msra.mxu0 %v2241_v32  ;;  %754 = vmatpush1.bf16.msra.mxu1 %v2314_v61  ;;  %v2333_v32 = vld [vmem:[#allocation8] ss:$8 sps:$4 sm:$0xff]  }
  0xbf   :  { %481 = vmatprep.subr.bf16.mxu0 %v2242_v33  ;;  %755 = vmatprep.subr.bf16.mxu1 %v2315_v62  ;;  %v2375_v61 = vld [vmem:[#allocation8 + $0xe0] ss:$8 sps:$4 sm:$0xff]   ;;  %v2380_v62 = vld [vmem:[#allocation8 + $0xf4] ss:$8 sps:$4 sm:$0xff]  }
  0xc2   :  { %482 = vmatpush1.bf16.msra.mxu0 %v2244_v36  ;;  %756 = vmatpush1.bf16.msra.mxu1 %v2317_v1  ;;  %v2341_v36 = vld [vmem:[#allocation8 + $0x24] ss:$8 sps:$4 sm:$0xff]  }
  0xc3   :  { %483 = vmatprep.subr.bf16.mxu0 %v2245_v37  ;;  %757 = vmatprep.subr.bf16.mxu1 %v2318_v2  ;;  %v2339_v37 = vld [vmem:[#allocation8 + $0x20] ss:$8 sps:$4 sm:$0xff]   ;;  %v2383_v1 = vld [vmem:[#allocation10 + $0x4] ss:$8 sps:$4 sm:$0xff]   ;;  %v2386_v2 = vld [vmem:[#allocation10 + $0x14] ss:$8 sps:$4 sm:$0xff]  }
  0xc6   :  { %484 = vmatpush1.bf16.msra.mxu0 %v2247_v40  ;;  %758 = vmatpush1.bf16.msra.mxu1 %v2320_v5  ;;  %v2347_v40 = vld [vmem:[#allocation8 + $0x44] ss:$8 sps:$4 sm:$0xff]   ;;  %v2387_v5 = vld [vmem:[#allocation10 + $0x20] ss:$8 sps:$4 sm:$0xff]  }
  0xc7   :  { %485 = vmatprep.subr.bf16.mxu0 %v2248_v41  ;;  %759 = vmatprep.subr.bf16.mxu1 %v2321_v6  ;;  %v2345_v41 = vld [vmem:[#allocation8 + $0x40] ss:$8 sps:$4 sm:$0xff]   ;;  %v2392_v6 = vld [vmem:[#allocation10 + $0x34] ss:$8 sps:$4 sm:$0xff]  }
  0xca   :  { %486 = vmatpush1.bf16.msra.mxu0 %v2250_v43  ;;  %760 = vmatpush1.bf16.msra.mxu1 %v2323_v9  ;;  %v2348_v43 = vld [vmem:[#allocation8 + $0x50] ss:$8 sps:$4 sm:$0xff]   ;;  %v2393_v9 = vld [vmem:[#allocation10 + $0x40] ss:$8 sps:$4 sm:$0xff]  }
  0xcb   :  { %487 = vmatprep.subr.bf16.mxu0 %v2251_v45  ;;  %761 = vmatprep.subr.bf16.mxu1 %v2324_v10  ;;  %v2351_v45 = vld [vmem:[#allocation8 + $0x60] ss:$8 sps:$4 sm:$0xff]   ;;  %v2398_v10 = vld [vmem:[#allocation10 + $0x54] ss:$8 sps:$4 sm:$0xff]  }
  0xce   :  { %488 = vmatpush1.bf16.msra.mxu0 %v2253_v48  ;;  %762 = vmatpush1.bf16.msra.mxu1 %v2326_v13  ;;  %v2359_v48 = vld [vmem:[#allocation8 + $0x84] ss:$8 sps:$4 sm:$0xff]   ;;  %v2399_v13 = vld [vmem:[#allocation10 + $0x60] ss:$8 sps:$4 sm:$0xff]  }
  0xcf   :  { %498 = vmatprep.subr.bf16.mxu0 %v2258_v49  ;;  %763 = vmatprep.subr.bf16.mxu1 %v2327_v14  ;;  %v2357_v49 = vld [vmem:[#allocation8 + $0x80] ss:$8 sps:$4 sm:$0xff]   ;;  %v2404_v14 = vld [vmem:[#allocation10 + $0x74] ss:$8 sps:$4 sm:$0xff]  }
  0xd1   :  { %490 = vmatmul.mubr.bf16.vlgmr.msra.gmra.mrb[0].mxu0 %v1936_v54  ;;  %v2368_v54 = vld [vmem:[#allocation8 + $0xb4] ss:$8 sps:$4 sm:$0xff]  }
  0xd2   :  { %499 = vmatpush1.bf16.msra.mxu0 %v2256_v53  ;;  %1990 = vmatprep.mubr.msk.bf16.mxu0 %vm453_vm0, %v1939_v56  ;;  %v2363_v53 = vld [vmem:[#allocation8 + $0xa0] ss:$8 sps:$4 sm:$0xff]   ;;  %v2371_v56 = vld [vmem:[#allocation8 + $0xc4] ss:$8 sps:$4 sm:$0xff]  }
  0xd3   :  { %500 = vmatprep.subr.bf16.mxu0 %v2261_v55  ;;  %764 = vmatpush1.bf16.msra.mxu1 %v2329_v21  ;;  %v2366_v55 = vld [vmem:[#allocation8 + $0xb0] ss:$8 sps:$4 sm:$0xff]   ;;  %v2411_v21 = vld [vmem:[#allocation10 + $0xa0] ss:$8 sps:$4 sm:$0xff]  }
  0xd4   :  { %765 = vmatprep.subr.bf16.mxu1 %v2330_v22  ;;  %v2416_v22 = vld [vmem:[#allocation10 + $0xb4] ss:$8 sps:$4 sm:$0xff]  }
  0xd6   :  { %501 = vmatpush1.bf16.msra.mxu0 %v2259_v59  ;;  %v2372_v59 = vld [vmem:[#allocation8 + $0xd0] ss:$8 sps:$4 sm:$0xff]  }
  0xd7   :  { %502 = vmatprep.subr.bf16.mxu0 %v2264_v60  ;;  %766 = vmatpush1.bf16.msra.mxu1 %v2332_v23  ;;  %v2377_v60 = vld [vmem:[#allocation8 + $0xe4] ss:$8 sps:$4 sm:$0xff]   ;;  %v2414_v23 = vld [vmem:[#allocation10 + $0xb0] ss:$8 sps:$4 sm:$0xff]  }
  0xd8   :  { %972 = vmatprep.subr.bf16.mxu1 %v2335_v24  ;;  %v2419_v24 = vld [vmem:[#allocation10 + $0xc4] ss:$8 sps:$4 sm:$0xff]  }
  0xda   :  { %503 = vmatpush1.bf16.msra.mxu0 %v2262_v63  ;;  %v2378_v63 = vld [vmem:[#allocation8 + $0xf0] ss:$8 sps:$4 sm:$0xff]  }
  0xdb   :  { %504 = vmatprep.subr.bf16.mxu0 %v2267_v0  ;;  %v2381_v0 = vld [vmem:[#allocation10] ss:$8 sps:$4 sm:$0xff]  }
  0xde   :  { %505 = vmatpush1.bf16.msra.mxu0 %v2265_v3  ;;  %v2384_v3 = vld [vmem:[#allocation10 + $0x10] ss:$8 sps:$4 sm:$0xff]  }
  0xdf   :  { %506 = vmatprep.subr.bf16.mxu0 %v2270_v4  ;;  %v2389_v4 = vld [vmem:[#allocation10 + $0x24] ss:$8 sps:$4 sm:$0xff]  }
  0xe2   :  { %507 = vmatpush1.bf16.msra.mxu0 %v2268_v7  ;;  %v2390_v7 = vld [vmem:[#allocation10 + $0x30] ss:$8 sps:$4 sm:$0xff]  }
  0xe3   :  { %508 = vmatprep.subr.bf16.mxu0 %v2273_v8  ;;  %v2395_v8 = vld [vmem:[#allocation10 + $0x44] ss:$8 sps:$4 sm:$0xff]  }
  0xe6   :  { %509 = vmatpush1.bf16.msra.mxu0 %v2271_v11  ;;  %v2396_v11 = vld [vmem:[#allocation10 + $0x50] ss:$8 sps:$4 sm:$0xff]  }
  0xe7   :  { %510 = vmatprep.subr.bf16.mxu0 %v2276_v12  ;;  %v2401_v12 = vld [vmem:[#allocation10 + $0x64] ss:$8 sps:$4 sm:$0xff]  }
  0xea   :  { %511 = vmatpush1.bf16.msra.mxu0 %v2274_v15  ;;  %v2402_v15 = vld [vmem:[#allocation10 + $0x70] ss:$8 sps:$4 sm:$0xff]  }
  0xeb   :  { %512 = vmatprep.subr.bf16.mxu0 %v2279_v16  ;;  %v2407_v16 = vld [vmem:[#allocation10 + $0x84] ss:$8 sps:$4 sm:$0xff]  }
  0xee   :  { %513 = vmatpush1.bf16.msra.mxu0 %v2277_v17  ;;  %v2405_v17 = vld [vmem:[#allocation10 + $0x80] ss:$8 sps:$4 sm:$0xff]  }
  0xef   :  { %514 = vmatprep.subr.bf16.mxu0 %v2282_v18  ;;  %v2410_v18 = vld [vmem:[#allocation10 + $0x94] ss:$8 sps:$4 sm:$0xff]  }
  0xf2   :  { %515 = vmatpush1.bf16.msra.mxu0 %v2280_v19  ;;  %v2408_v19 = vld [vmem:[#allocation10 + $0x90] ss:$8 sps:$4 sm:$0xff]  }
  0xf3   :  { %1209 = vmatprep.subr.bf16.mxu0 %v2383_v1  ;;  %v2465_v1 = vld [vmem:[#allocation11 + $0xc0] ss:$8 sps:$4 sm:$0xff]  }
  0xf5   :  { %531 = vmatmul.mubr.bf16.vlgmr.msra.gmra.mrb[0].mxu0 %v1938_v20  ;;  %v2413_v20 = vld [vmem:[#allocation10 + $0xa4] ss:$8 sps:$4 sm:$0xff]  }
  0xf6   :  { %1210 = vmatpush1.bf16.msra.mxu0 %v2381_v0  ;;  %v2467_v0 = vld [vmem:[#allocation11 + $0xc4] ss:$8 sps:$4 sm:$0xff]  }
  0xf7   :  { %1211 = vmatprep.subr.bf16.mxu0 %v2386_v2  ;;  %v2470_v2 = vld [vmem:[#allocation11 + $0xd4] ss:$8 sps:$4 sm:$0xff]  }
  0xfa   :  { %1212 = vmatpush1.bf16.msra.mxu0 %v2384_v3  ;;  %v2468_v3 = vld [vmem:[#allocation11 + $0xd0] ss:$8 sps:$4 sm:$0xff]  }
  0xfb   :  { %1213 = vmatprep.subr.bf16.mxu0 %v2389_v4  ;;  %v2473_v4 = vld [vmem:[#allocation11 + $0xe4] ss:$8 sps:$4 sm:$0xff]  }
  0xfe   :  { %1214 = vmatpush1.bf16.msra.mxu0 %v2387_v5  ;;  %v2471_v5 = vld [vmem:[#allocation11 + $0xe0] ss:$8 sps:$4 sm:$0xff]  }
  0xff   :  { %1215 = vmatprep.subr.bf16.mxu0 %v2392_v6 }
 0x102   :  { %1216 = vmatpush1.bf16.msra.mxu0 %v2390_v7 }
 0x103   :  { %1217 = vmatprep.subr.bf16.mxu0 %v2395_v8 }
 0x106   :  { %1218 = vmatpush1.bf16.msra.mxu0 %v2393_v9 }
 0x107   :  { %1219 = vmatprep.subr.bf16.mxu0 %v2398_v10 }
 0x10a   :  { %1220 = vmatpush1.bf16.msra.mxu0 %v2396_v11 }
 0x10b   :  { %1221 = vmatprep.subr.bf16.mxu0 %v2401_v12 }
 0x10e   :  { %1222 = vmatpush1.bf16.msra.mxu0 %v2399_v13 }
 0x10f   :  { %1223 = vmatprep.subr.bf16.mxu0 %v2404_v14  ;;  %v2476_v14 = vld [vmem:[#allocation11 + $0xf4] ss:$8 sps:$4 sm:$0xff]  }
 0x112   :  { %1224 = vmatpush1.bf16.msra.mxu0 %v2402_v15  ;;  %v2474_v15 = vld [vmem:[#allocation11 + $0xf0] ss:$8 sps:$4 sm:$0xff]  }
 0x113   :  { %1225 = vmatprep.subr.bf16.mxu0 %v2407_v16  ;;  %v2477_v16 = vld [vmem:[#allocation13] ss:$8 sps:$4 sm:$0xff]  }
 0x116   :  { %1226 = vmatpush1.bf16.msra.mxu0 %v2405_v17  ;;  %v2479_v17 = vld [vmem:[#allocation13 + $0x4] ss:$8 sps:$4 sm:$0xff]  }
 0x117   :  { %1227 = vmatprep.subr.bf16.mxu0 %v2410_v18  ;;  %v2482_v18 = vld [vmem:[#allocation13 + $0x14] ss:$8 sps:$4 sm:$0xff]  }
 0x11a   :  { %1228 = vmatpush1.bf16.msra.mxu0 %v2408_v19  ;;  %v2480_v19 = vld [vmem:[#allocation13 + $0x10] ss:$8 sps:$4 sm:$0xff]  }
 0x11b   :  { %1229 = vmatprep.subr.bf16.mxu0 %v2413_v20  ;;  %v2485_v20 = vld [vmem:[#allocation13 + $0x24] ss:$8 sps:$4 sm:$0xff]  }
 0x11e   :  { %1230 = vmatpush1.bf16.msra.mxu0 %v2411_v21  ;;  %v2483_v21 = vld [vmem:[#allocation13 + $0x20] ss:$8 sps:$4 sm:$0xff]  }
 0x11f   :  { %1231 = vmatprep.subr.bf16.mxu0 %v2416_v22  ;;  %v2488_v22 = vld [vmem:[#allocation13 + $0x34] ss:$8 sps:$4 sm:$0xff]  }
 0x122   :  { %1232 = vmatpush1.bf16.msra.mxu0 %v2414_v23  ;;  %v2486_v23 = vld [vmem:[#allocation13 + $0x30] ss:$8 sps:$4 sm:$0xff]  }
 0x123   :  { %1233 = vmatprep.subr.bf16.mxu0 %v2419_v24  ;;  %v2491_v24 = vld [vmem:[#allocation13 + $0x44] ss:$8 sps:$4 sm:$0xff]  }
 0x1c8   :  { %v532_v25 = vpop.f32.mrb[0].mxu0 }
 0x1c9   :  { %v539_v26 = vmax.f32 %v532_v25, 0.0  ;;  %v534_v27 = vpop.f32.mrb[1].mxu0  ;;  %v2417_v25 = vld [vmem:[#allocation10 + $0xc0] ss:$8 sps:$4 sm:$0xff]  }
 0x1ca   :  { %v536_v28 = vpop.f32.mrb[2].mxu0  ;;  %v540_v29 = vmax.f32 %v534_v27, 0.0  ;;  %1234 = vmatpush1.bf16.msra.mxu0 %v2417_v25  ;;  %v2420_v27 = vld [vmem:[#allocation10 + $0xd0] ss:$8 sps:$4 sm:$0xff]   ;;  %v2489_v25 = vld [vmem:[#allocation13 + $0x40] ss:$8 sps:$4 sm:$0xff]  }
 0x1cb   :  { %v537_v30 = vpop.f32.mrb[3].mxu0  ;;  %v541_v33 = vpack.c.bf16 %v539_v26, %v539_v26  ;;  %v2422_v26 = vld [vmem:[#allocation10 + $0xd4] ss:$8 sps:$4 sm:$0xff]   ;;  %v2425_v28 = vld [vmem:[#allocation10 + $0xe4] ss:$8 sps:$4 sm:$0xff]  }
 0x1cc   :  { %v542_v31 = vpack.c.bf16 %v540_v29, %v540_v29  ;;  %1235 = vmatprep.subr.bf16.mxu0 %v2422_v26  ;;  %v2423_v29 = vld [vmem:[#allocation10 + $0xe0] ss:$8 sps:$4 sm:$0xff]   ;;  %v2494_v26 = vld [vmem:[#allocation13 + $0x54] ss:$8 sps:$4 sm:$0xff]  }
 0x1ce   :  { %767 = vmatprep.mubr.bf16.mxu1 %v542_v31  ;;  %1236 = vmatpush1.bf16.msra.mxu0 %v2420_v27  ;;  %v2492_v27 = vld [vmem:[#allocation13 + $0x50] ss:$8 sps:$4 sm:$0xff]  }
 0x1cf   :  { %768 = vmatmul.mubr.bf16.vlgmr.msra.gmra.mrb[0].mxu1 %v541_v33  ;;  %1237 = vmatprep.subr.bf16.mxu0 %v2425_v28  ;;  %v2497_v28 = vld [vmem:[#allocation13 + $0x64] ss:$8 sps:$4 sm:$0xff]  }
 0x1d0   :  { %973 = vmatpush1.bf16.msra.mxu1 %v2333_v32 }
 0x1d1   :  { %974 = vmatprep.subr.bf16.mxu1 %v2338_v34 }
 0x1d2   :  { %1238 = vmatpush1.bf16.msra.mxu0 %v2423_v29  ;;  %v2495_v29 = vld [vmem:[#allocation13 + $0x60] ss:$8 sps:$4 sm:$0xff]  }
 0x1d4   :  { %975 = vmatpush1.bf16.msra.mxu1 %v2336_v35 }
 0x1d5   :  { %976 = vmatprep.subr.bf16.mxu1 %v2341_v36 }
 0x1d8   :  { %977 = vmatpush1.bf16.msra.mxu1 %v2339_v37 }
 0x1d9   :  { %978 = vmatprep.subr.bf16.mxu1 %v2344_v38  ;;  %v2428_v38 = vld [vmem:[#allocation10 + $0xf4] ss:$8 sps:$4 sm:$0xff]  }
 0x1da   :  { %1239 = vmatprep.subr.bf16.mxu0 %v2428_v38  ;;  %v2512_v38 = vld [vmem:[#allocation13 + $0xb4] ss:$8 sps:$4 sm:$0xff]  }
 0x1dc   :  { %979 = vmatpush1.bf16.msra.mxu1 %v2342_v39  ;;  %v2426_v39 = vld [vmem:[#allocation10 + $0xf0] ss:$8 sps:$4 sm:$0xff]  }
 0x1dd   :  { %980 = vmatprep.subr.bf16.mxu1 %v2347_v40  ;;  %1240 = vmatpush1.bf16.msra.mxu0 %v2426_v39  ;;  %v2429_v40 = vld [vmem:[#allocation11] ss:$8 sps:$4 sm:$0xff]   ;;  %v2510_v39 = vld [vmem:[#allocation13 + $0xb0] ss:$8 sps:$4 sm:$0xff]  }
 0x1de   :  { %1683 = vmatprep.subr.bf16.mxu0 %v2479_v17 }
 0x1e0   :  { %981 = vmatpush1.bf16.msra.mxu1 %v2345_v41  ;;  %v2431_v41 = vld [vmem:[#allocation11 + $0x4] ss:$8 sps:$4 sm:$0xff]  }
 0x1e1   :  { %982 = vmatprep.subr.bf16.mxu1 %v2350_v42  ;;  %v2434_v42 = vld [vmem:[#allocation11 + $0x14] ss:$8 sps:$4 sm:$0xff]  }
 0x1e4   :  { %983 = vmatpush1.bf16.msra.mxu1 %v2348_v43  ;;  %v2432_v43 = vld [vmem:[#allocation11 + $0x10] ss:$8 sps:$4 sm:$0xff]  }
 0x1e5   :  { %984 = vmatprep.subr.bf16.mxu1 %v2353_v44  ;;  %v2437_v44 = vld [vmem:[#allocation11 + $0x24] ss:$8 sps:$4 sm:$0xff]  }
 0x1e8   :  { %985 = vmatpush1.bf16.msra.mxu1 %v2351_v45  ;;  %v2435_v45 = vld [vmem:[#allocation11 + $0x20] ss:$8 sps:$4 sm:$0xff]  }
 0x1e9   :  { %986 = vmatprep.subr.bf16.mxu1 %v2356_v46  ;;  %v2440_v46 = vld [vmem:[#allocation11 + $0x34] ss:$8 sps:$4 sm:$0xff]  }
 0x1ec   :  { %987 = vmatpush1.bf16.msra.mxu1 %v2354_v47  ;;  %v2438_v47 = vld [vmem:[#allocation11 + $0x30] ss:$8 sps:$4 sm:$0xff]  }
 0x1ed   :  { %988 = vmatprep.subr.bf16.mxu1 %v2359_v48  ;;  %v2443_v48 = vld [vmem:[#allocation11 + $0x44] ss:$8 sps:$4 sm:$0xff]  }
 0x1f0   :  { %989 = vmatpush1.bf16.msra.mxu1 %v2357_v49  ;;  %v2441_v49 = vld [vmem:[#allocation11 + $0x40] ss:$8 sps:$4 sm:$0xff]  }
 0x1f1   :  { %990 = vmatprep.subr.bf16.mxu1 %v2362_v50  ;;  %v2446_v50 = vld [vmem:[#allocation11 + $0x54] ss:$8 sps:$4 sm:$0xff]  }
 0x1f4   :  { %991 = vmatpush1.bf16.msra.mxu1 %v2360_v51  ;;  %v2444_v51 = vld [vmem:[#allocation11 + $0x50] ss:$8 sps:$4 sm:$0xff]  }
 0x1f5   :  { %992 = vmatprep.subr.bf16.mxu1 %v2365_v52  ;;  %v2449_v52 = vld [vmem:[#allocation11 + $0x64] ss:$8 sps:$4 sm:$0xff]  }
 0x1f8   :  { %993 = vmatpush1.bf16.msra.mxu1 %v2363_v53  ;;  %v2447_v53 = vld [vmem:[#allocation11 + $0x60] ss:$8 sps:$4 sm:$0xff]  }
 0x1f9   :  { %994 = vmatprep.subr.bf16.mxu1 %v2368_v54  ;;  %v2452_v54 = vld [vmem:[#allocation11 + $0x74] ss:$8 sps:$4 sm:$0xff]  }
 0x1fc   :  { %995 = vmatpush1.bf16.msra.mxu1 %v2366_v55  ;;  %v2450_v55 = vld [vmem:[#allocation11 + $0x70] ss:$8 sps:$4 sm:$0xff]  }
 0x1fd   :  { %996 = vmatprep.subr.bf16.mxu1 %v2371_v56  ;;  %v2455_v56 = vld [vmem:[#allocation11 + $0x84] ss:$8 sps:$4 sm:$0xff]  }
 0x200   :  { %997 = vmatpush1.bf16.msra.mxu1 %v2369_v57  ;;  %v2453_v57 = vld [vmem:[#allocation11 + $0x80] ss:$8 sps:$4 sm:$0xff]  }
 0x201   :  { %998 = vmatprep.subr.bf16.mxu1 %v2374_v58  ;;  %v2458_v58 = vld [vmem:[#allocation11 + $0x94] ss:$8 sps:$4 sm:$0xff]  }
 0x204   :  { %999 = vmatpush1.bf16.msra.mxu1 %v2372_v59  ;;  %v2456_v59 = vld [vmem:[#allocation11 + $0x90] ss:$8 sps:$4 sm:$0xff]  }
 0x205   :  { %1000 = vmatprep.subr.bf16.mxu1 %v2377_v60  ;;  %v2461_v60 = vld [vmem:[#allocation11 + $0xa4] ss:$8 sps:$4 sm:$0xff]  }
 0x208   :  { %1001 = vmatpush1.bf16.msra.mxu1 %v2375_v61  ;;  %v2459_v61 = vld [vmem:[#allocation11 + $0xa0] ss:$8 sps:$4 sm:$0xff]  }
 0x209   :  { %1002 = vmatprep.subr.bf16.mxu1 %v2380_v62  ;;  %v2464_v62 = vld [vmem:[#allocation11 + $0xb4] ss:$8 sps:$4 sm:$0xff]  }
 0x20c   :  { %1003 = vmatpush1.bf16.msra.mxu1 %v2378_v63  ;;  %v2462_v63 = vld [vmem:[#allocation11 + $0xb0] ss:$8 sps:$4 sm:$0xff]  }
 0x20d   :  { %1446 = vmatprep.subr.bf16.mxu1 %v2431_v41  ;;  %v2513_v41 = vld [vmem:[#allocation13 + $0xc0] ss:$8 sps:$4 sm:$0xff]  }
 0x2a2   :  { %v769_v30 = vpop.f32.mrb[0].mxu1 }
 0x2a3   :  { %v776_v31 = vmax.f32 %v769_v30, 0.0  ;;  %v771_v32 = vpop.f32.mrb[1].mxu1  ;;  %v2500_v30 = vld [vmem:[#allocation13 + $0x74] ss:$8 sps:$4 sm:$0xff]  }
 0x2a4   :  { %v777_v33 = vmax.f32 %v771_v32, 0.0  ;;  %v773_v34 = vpop.f32.mrb[2].mxu1  ;;  %v2503_v32 = vld [vmem:[#allocation13 + $0x84] ss:$8 sps:$4 sm:$0xff]  }
 0x2a5   :  { %v774_v35 = vpop.f32.mrb[3].mxu1  ;;  %v778_v37 = vpack.c.bf16 %v776_v31, %v776_v31  ;;  %v2498_v31 = vld [vmem:[#allocation13 + $0x70] ss:$8 sps:$4 sm:$0xff]   ;;  %v2506_v34 = vld [vmem:[#allocation13 + $0x94] ss:$8 sps:$4 sm:$0xff]  }
 0x2a6   :  { %v779_v36 = vpack.c.bf16 %v777_v33, %v777_v33  ;;  %v2501_v33 = vld [vmem:[#allocation13 + $0x80] ss:$8 sps:$4 sm:$0xff]   ;;  %v2504_v35 = vld [vmem:[#allocation13 + $0x90] ss:$8 sps:$4 sm:$0xff]  }
 0x2a8   :  { %1004 = vmatprep.mubr.bf16.mxu1 %v779_v36  ;;  %v2509_v36 = vld [vmem:[#allocation13 + $0xa4] ss:$8 sps:$4 sm:$0xff]  }
 0x2a9   :  { %1005 = vmatmul.mubr.bf16.vlgmr.msra.gmra.mrb[4].mxu1 %v778_v37  ;;  %v2507_v37 = vld [vmem:[#allocation13 + $0xa0] ss:$8 sps:$4 sm:$0xff]  }
 0x2aa   :  { %1447 = vmatpush1.bf16.msra.mxu1 %v2429_v40  ;;  %v2515_v40 = vld [vmem:[#allocation13 + $0xc4] ss:$8 sps:$4 sm:$0xff]  }
 0x2ab   :  { %1448 = vmatprep.subr.bf16.mxu1 %v2434_v42  ;;  %v2518_v42 = vld [vmem:[#allocation13 + $0xd4] ss:$8 sps:$4 sm:$0xff]  }
 0x2ae   :  { %1449 = vmatpush1.bf16.msra.mxu1 %v2432_v43  ;;  %v2516_v43 = vld [vmem:[#allocation13 + $0xd0] ss:$8 sps:$4 sm:$0xff]  }
 0x2af   :  { %1450 = vmatprep.subr.bf16.mxu1 %v2437_v44  ;;  %v2521_v44 = vld [vmem:[#allocation13 + $0xe4] ss:$8 sps:$4 sm:$0xff]  }
 0x2b2   :  { %1451 = vmatpush1.bf16.msra.mxu1 %v2435_v45  ;;  %v2519_v45 = vld [vmem:[#allocation13 + $0xe0] ss:$8 sps:$4 sm:$0xff]  }
 0x2b3   :  { %1452 = vmatprep.subr.bf16.mxu1 %v2440_v46 }
 0x2b6   :  { %1453 = vmatpush1.bf16.msra.mxu1 %v2438_v47 }
 0x2b7   :  { %1454 = vmatprep.subr.bf16.mxu1 %v2443_v48 }
 0x2ba   :  { %1455 = vmatpush1.bf16.msra.mxu1 %v2441_v49 }
 0x2bb   :  { %1456 = vmatprep.subr.bf16.mxu1 %v2446_v50 }
 0x2be   :  { %1457 = vmatpush1.bf16.msra.mxu1 %v2444_v51 }
 0x2bf   :  { %1458 = vmatprep.subr.bf16.mxu1 %v2449_v52 }
 0x2c2   :  { %1459 = vmatpush1.bf16.msra.mxu1 %v2447_v53 }
 0x2c3   :  { %1460 = vmatprep.subr.bf16.mxu1 %v2452_v54  ;;  %v2524_v54 = vld [vmem:[#allocation13 + $0xf4] ss:$8 sps:$4 sm:$0xff]  }
 0x2c6   :  { %1461 = vmatpush1.bf16.msra.mxu1 %v2450_v55  ;;  %v2522_v55 = vld [vmem:[#allocation13 + $0xf0] ss:$8 sps:$4 sm:$0xff]  }
 0x2c7   :  { %1462 = vmatprep.subr.bf16.mxu1 %v2455_v56  ;;  %v2525_v56 = vld [vmem:[#allocation14 + $0x40] sm:$0xff]  }
 0x2ca   :  { %1463 = vmatpush1.bf16.msra.mxu1 %v2453_v57  ;;  %v2526_v57 = vld [vmem:[#allocation14] sm:$0xff]  }
 0x2cb   :  { %1464 = vmatprep.subr.bf16.mxu1 %v2458_v58  ;;  %v2527_v58 = vld [vmem:[#allocation14 + $0x48] sm:$0xff]  }
 0x2ce   :  { %1465 = vmatpush1.bf16.msra.mxu1 %v2456_v59  ;;  %v2528_v59 = vld [vmem:[#allocation14 + $0x8] sm:$0xff]  }
 0x2cf   :  { %1466 = vmatprep.subr.bf16.mxu1 %v2461_v60  ;;  %v2529_v60 = vld [vmem:[#allocation14 + $0x50] sm:$0xff]  }
 0x2d2   :  { %1467 = vmatpush1.bf16.msra.mxu1 %v2459_v61  ;;  %v2530_v61 = vld [vmem:[#allocation14 + $0x10] sm:$0xff]  }
 0x2d3   :  { %1468 = vmatprep.subr.bf16.mxu1 %v2464_v62  ;;  %v2531_v62 = vld [vmem:[#allocation14 + $0x58] sm:$0xff]  }
 0x2d6   :  { %1469 = vmatpush1.bf16.msra.mxu1 %v2462_v63  ;;  %v2532_v63 = vld [vmem:[#allocation14 + $0x18] sm:$0xff]  }
 0x2d7   :  { %1470 = vmatprep.subr.bf16.mxu1 %v2467_v0  ;;  %v2533_v0 = vld [vmem:[#allocation14 + $0x60] sm:$0xff]  }
 0x2da   :  { %1471 = vmatpush1.bf16.msra.mxu1 %v2465_v1  ;;  %v2534_v1 = vld [vmem:[#allocation14 + $0x20] sm:$0xff]  }
 0x2db   :  { %1472 = vmatprep.subr.bf16.mxu1 %v2470_v2  ;;  %v2535_v2 = vld [vmem:[#allocation14 + $0x68] sm:$0xff]  }
 0x2de   :  { %1473 = vmatpush1.bf16.msra.mxu1 %v2468_v3  ;;  %v2536_v3 = vld [vmem:[#allocation14 + $0x28] sm:$0xff]  }
 0x2df   :  { %1474 = vmatprep.subr.bf16.mxu1 %v2473_v4  ;;  %v2537_v4 = vld [vmem:[#allocation14 + $0x70] sm:$0xff]  }
 0x2e2   :  { %1475 = vmatpush1.bf16.msra.mxu1 %v2471_v5 }
 0x2e3   :  { %1476 = vmatprep.subr.bf16.mxu1 %v2476_v14  ;;  %v2539_v14 = vld [vmem:[#allocation14 + $0x78] sm:$0xff]  }
 0x2e6   :  { %1477 = vmatpush1.bf16.msra.mxu1 %v2474_v15  ;;  %v2540_v15 = vld [vmem:[#allocation14 + $0x38] sm:$0xff]  }
 0x2e7   :  { %2167 = vmatprep.subr.bf16.mxu1 %v2525_v56 }
 0x37c   :  { %v1006_v6 = vpop.f32.mrb[4].mxu1 }
 0x37d   :  { %v1013_v7 = vmax.f32 %v1006_v6, 0.0  ;;  %v1008_v8 = vpop.f32.mrb[5].mxu1 }
 0x37e   :  { %v1014_v9 = vmax.f32 %v1008_v8, 0.0  ;;  %v1010_v10 = vpop.f32.mrb[6].mxu1 }
 0x37f   :  { %v1011_v11 = vpop.f32.mrb[7].mxu1  ;;  %v1015_v13 = vpack.c.bf16 %v1013_v7, %v1013_v7 }
 0x380   :  { %v1016_v12 = vpack.c.bf16 %v1014_v9, %v1014_v9 }
 0x382   :  { %1241 = vmatprep.mubr.bf16.mxu0 %v1016_v12 }
 0x383   :  { %1242 = vmatmul.mubr.bf16.vlgmr.msra.gmra.mrb[4].mxu0 %v1015_v13  ;;  %v2538_v13 = vld [vmem:[#allocation14 + $0x30] sm:$0xff]  }
 0x384   :  { %1684 = vmatpush1.bf16.msra.mxu0 %v2477_v16 }
 0x385   :  { %1685 = vmatprep.subr.bf16.mxu0 %v2482_v18 }
 0x388   :  { %1686 = vmatpush1.bf16.msra.mxu0 %v2480_v19 }
 0x389   :  { %1687 = vmatprep.subr.bf16.mxu0 %v2485_v20 }
 0x38c   :  { %1688 = vmatpush1.bf16.msra.mxu0 %v2483_v21 }
 0x38d   :  { %1689 = vmatprep.subr.bf16.mxu0 %v2488_v22 }
 0x390   :  { %1690 = vmatpush1.bf16.msra.mxu0 %v2486_v23 }
 0x391   :  { %1691 = vmatprep.subr.bf16.mxu0 %v2491_v24 }
 0x394   :  { %1692 = vmatpush1.bf16.msra.mxu0 %v2489_v25 }
 0x395   :  { %1693 = vmatprep.subr.bf16.mxu0 %v2494_v26 }
 0x398   :  { %1694 = vmatpush1.bf16.msra.mxu0 %v2492_v27 }
 0x399   :  { %1695 = vmatprep.subr.bf16.mxu0 %v2497_v28 }
 0x39c   :  { %1696 = vmatpush1.bf16.msra.mxu0 %v2495_v29 }
 0x39d   :  { %1697 = vmatprep.subr.bf16.mxu0 %v2500_v30  ;;  %v1896_v30 = vlaneseq }
 0x3a0   :  { %1698 = vmatpush1.bf16.msra.mxu0 %v2498_v31 }
 0x3a1   :  { %1699 = vmatprep.subr.bf16.mxu0 %v2503_v32 }
 0x3a4   :  { %1700 = vmatpush1.bf16.msra.mxu0 %v2501_v33  ;;  %v1897_v33 = vand.u32 127, %v1896_v30 }
 0x3a5   :  { %1701 = vmatprep.subr.bf16.mxu0 %v2506_v34 }
 0x3a6   :  { %vm1899_vm1 = vcmp.ge.s32.totalorder %v1897_v33, 100  ;;  %vm1900_vm2 = vcmp.lt.s32.totalorder %v1897_v33, 110  ;;  %vm1898_vm3 = vcmp.lt.s32.totalorder %v1897_v33, 50  ;;  %vm1903_vm6 = vcmp.ge.s32.totalorder %v1897_v33, 120 }
 0x3a7   :  { %vm1901_vm4 = vmand %vm1899_vm1, %vm1900_vm2 }
 0x3a8   :  { %1702 = vmatpush1.bf16.msra.mxu0 %v2504_v35  ;;  %vm1902_vm5 = vmor %vm1898_vm3, %vm1901_vm4 }
 0x3a9   :  { %1703 = vmatprep.subr.bf16.mxu0 %v2509_v36  ;;  %vm1904_vm7 = vmor %vm1902_vm5, %vm1903_vm6 }
 0x3ac   :  { %1704 = vmatpush1.bf16.msra.mxu0 %v2507_v37 }
 0x3ad   :  { %1705 = vmatprep.subr.bf16.mxu0 %v2512_v38 }
 0x3b0   :  { %1706 = vmatpush1.bf16.msra.mxu0 %v2510_v39 }
 0x3b1   :  { %1707 = vmatprep.subr.bf16.mxu0 %v2515_v40 }
 0x3b4   :  { %1708 = vmatpush1.bf16.msra.mxu0 %v2513_v41 }
 0x3b5   :  { %1709 = vmatprep.subr.bf16.mxu0 %v2518_v42 }
 0x3b8   :  { %1710 = vmatpush1.bf16.msra.mxu0 %v2516_v43 }
 0x3b9   :  { %1711 = vmatprep.subr.bf16.mxu0 %v2521_v44 }
 0x3bc   :  { %1712 = vmatpush1.bf16.msra.mxu0 %v2519_v45 }
 0x3bd   :  { %1713 = vmatprep.subr.bf16.mxu0 %v2524_v54 }
 0x3c0   :  { %1714 = vmatpush1.bf16.msra.mxu0 %v2522_v55 }
 0x456   :  { %v1243_v46 = vpop.f32.mrb[4].mxu0 }
 0x457   :  { %v1250_v47 = vmax.f32 %v1243_v46, 0.0  ;;  %v1245_v48 = vpop.f32.mrb[5].mxu0 }
 0x458   :  { %v1251_v49 = vmax.f32 %v1245_v48, 0.0  ;;  %v1247_v50 = vpop.f32.mrb[6].mxu0 }
 0x459   :  { %v1248_v51 = vpop.f32.mrb[7].mxu0  ;;  %v1252_v53 = vpack.c.bf16 %v1250_v47, %v1250_v47 }
 0x45a   :  { %v1253_v52 = vpack.c.bf16 %v1251_v49, %v1251_v49 }
 0x45c   :  { %1478 = vmatprep.mubr.bf16.mxu1 %v1253_v52 }
 0x45d   :  { %1479 = vmatmul.mubr.bf16.vlgmr.msra.gmra.mrb[8].mxu1 %v1252_v53 }
 0x45e   :  { %2168 = vmatpush3.bf16.msra.mxu1 %v2526_v57 }
 0x45f   :  { %2169 = vmatprep.subr.bf16.mxu1 %v2527_v58 }
 0x462   :  { %2170 = vmatpush3.bf16.msra.mxu1 %v2528_v59 }
 0x463   :  { %2171 = vmatprep.subr.bf16.mxu1 %v2529_v60 }
 0x466   :  { %2172 = vmatpush3.bf16.msra.mxu1 %v2530_v61 }
 0x467   :  { %2173 = vmatprep.subr.bf16.mxu1 %v2531_v62 }
 0x46a   :  { %2174 = vmatpush3.bf16.msra.mxu1 %v2532_v63 }
 0x46b   :  { %2175 = vmatprep.subr.bf16.mxu1 %v2533_v0 }
 0x46e   :  { %2176 = vmatpush3.bf16.msra.mxu1 %v2534_v1 }
 0x46f   :  { %2177 = vmatprep.subr.bf16.mxu1 %v2535_v2 }
 0x472   :  { %2178 = vmatpush3.bf16.msra.mxu1 %v2536_v3 }
 0x473   :  { %2179 = vmatprep.subr.bf16.mxu1 %v2537_v4 }
 0x476   :  { %2180 = vmatpush3.bf16.msra.mxu1 %v2538_v13 }
 0x477   :  { %2181 = vmatprep.subr.bf16.mxu1 %v2539_v14 }
 0x47a   :  { %2182 = vmatpush3.bf16.msra.mxu1 %v2540_v15 }
 0x530   :  { %v1480_v5 = vpop.f32.mrb[8].mxu1 }
 0x531   :  { %v1487_v6 = vmax.f32 %v1480_v5, 0.0  ;;  %v1482_v7 = vpop.f32.mrb[9].mxu1 }
 0x532   :  { %v1488_v8 = vmax.f32 %v1482_v7, 0.0  ;;  %v1484_v9 = vpop.f32.mrb[10].mxu1 }
 0x533   :  { %v1485_v10 = vpop.f32.mrb[11].mxu1  ;;  %v1489_v12 = vpack.c.bf16 %v1487_v6, %v1487_v6 }
 0x534   :  { %v1490_v11 = vpack.c.bf16 %v1488_v8, %v1488_v8 }
 0x536   :  { %1715 = vmatprep.mubr.bf16.mxu0 %v1490_v11 }
 0x537   :  { %1716 = vmatmul.mubr.bf16.vlgmr.msra.gmra.mrb[8].mxu0 %v1489_v12 }
 0x60a   :  { %v1717_v16 = vpop.f32.mrb[8].mxu0 }
 0x60b   :  { %v1724_v17 = vmax.f32 %v1717_v16, 0.0  ;;  %v1719_v18 = vpop.f32.mrb[9].mxu0 }
 0x60c   :  { %v1725_v19 = vmax.f32 %v1719_v18, 0.0  ;;  %v1721_v20 = vpop.f32.mrb[10].mxu0 }
 0x60d   :  { %v1722_v21 = vpop.f32.mrb[11].mxu0  ;;  %v1726_v23 = vpack.c.bf16 %v1724_v17, %v1724_v17 }
 0x60e   :  { %v1727_v22 = vpack.c.bf16 %v1725_v19, %v1725_v19 }
 0x610   :  { %1888 = vmatprep.mubr.bf16.mxu1 %v1727_v22 }
 0x611   :  { %1889 = vmatmul.mubr.bf16.vlgmr.msra.gmra.mrb[12].mxu1 %v1726_v23 }
 0x6e4   :  { %v2183_v24 = vpop.f32.mrb[12].mxu1 }
 0x6e5   :  { %v2184_v25 = vpop.f32.mrb[13].mxu1 }
 0x6e6   :  { %v2185_v26 = vadd.f32 %v2184_v25, %v2183_v24  ;;  %v2186_v27 = vpop.f32.mrb[14].mxu1 }
 0x6e7   :  { %v2187_v28 = vpop.f32.mrb[15].mxu1 }
 0x6e8   :  { %v1905_v29 = vmul.f32 1.442695, %v2185_v26 }
 0x6ea   :  { %2541 = vpow2.f32 %v1905_v29 }
 0x6f4   :  { %v2542_v31 = vpop.eup %2541 }
 0x6f5   :  { %v1907_v32 = vadd.f32 1e-09, %v2542_v31 }
 0x6f7   :  { %2543 = vrsqrt.f32 %v1907_v32  ;;  %vm1910_vm8 = vcmp.eq.f32.partialorder %v1907_v32, inf  ;;  %v1913_v36 = vand.u32 2147483648, %v1907_v32  ;;  %vm1912_vm9 = vcmp.eq.f32.partialorder %v1907_v32, 0.0 }
 0x701   :  { %v2544_v34 = vpop.eup %2543 }
 0x702   :  { %v1909_v35 = vmul.f32 %v2544_v34, %v1907_v32 }
 0x704   :  { %v1911_v37 = vsel %vm1910_vm8, %v1907_v32, %v1909_v35 }
 0x705   :  { %v1914_v38 = vsel %vm1912_vm9, %v1913_v36, %v1911_v37 }
 0x706   :  { %v1915_v39 = vsel %vm1904_vm7, %v2185_v26, %v1914_v38 }
 0x707   :  { %1916 = vst [vmem:[#allocation16] sm:$0xff] %v1915_v39 }
 0x708   :  { %2732 = shalt.err (!%p2729_p12)
}
 0x709   :  { %s2733_s22 = scalar_lea.hbm %s2959_s8, 128 }
 0x70a   :  { %p2734_p13 = scmp.ne.s32.totalorder %s2959_s8, %s2733_s22  ;;  %p2737_p0 = scmp.lt.u32.totalorder %s2733_s22, %s2959_s8 }
 0x70c   :  { %p2739_p1 = pnand %p2737_p0, %p2734_p13 }
 0x70e   :  { %2742 = shalt.err (!%p2739_p1)
}
 0x70f   :  { %1926 = dma.vmem_to_hbm [thread:$0]  %s1924_s9, 128, %s2959_s8, [#allocation4]  }
 0x710   :  { %2753 = dma.done.wait [#allocation4], 128  }
 0x711   :  { %2754 = vsyncadd [#allocation4], 4294967168 }
 0x712   :  { %1930 = vsyncpa [#allocation3], 1 }
 0x713   :  { %1931 = vsyncpa [#allocation6], 1 }
 0x714   :  { %1932 = vsyncpa [#allocation9], 1 }
 0x715   :  { %1933 = vsyncpa [#allocation12], 1 }
 0x716   :  { %1934 = vsyncpa [#allocation15], 1 }
 0x717   :  { %1935 = vsyncpa [#allocation4], 1 }

</bundles_post_ra>
